<compile_context>
chip_gen: v7x
topology: tpu7x:2x2x1
jax: 0.10.0
libtpu: 0.0.40
codegen_flags: <defaults>
</compile_context>

<pallas_src>
import jax
import jax.numpy as jnp
from jax import lax
from jax.experimental import pallas as pl
from jax.experimental.pallas import tpu as pltpu

# ---------------------------------------------------------------------------
# problem sizes (small, consistent with the module)
# ---------------------------------------------------------------------------
N = 2          # batch
CIN = 4        # in_channels
COUT = 8       # out_channels (divisible by GroupNorm groups = 4)
L = 16         # input length
LH = L // 2    # length after stride-2 downsample
NL = N * LH    # batch folded onto the lane axis
G = 4          # GroupNorm groups
CPG = COUT // G
K = 5          # conv1 / conv2 kernel size
PAD = 2        # conv1 / conv2 padding
EPS = 1e-5
NEG_SLOPE = 0.01   # nn.LeakyReLU default

WD_COLS = 2 * CIN                 # fused downsample weight columns
WC_COLS = K * COUT                # fused conv1 / conv2 weight columns
W_TOTAL = WD_COLS + 2 * WC_COLS   # packed weight slab width


def _leaky(v):
    return jnp.where(v > 0, v, NEG_SLOPE * v)


# ---------------------------------------------------------------------------
# kernel: whole batch in one invocation, 3 operands, everything VMEM-resident
# ---------------------------------------------------------------------------
def basic_block_down_kernel(
    x_ref,    # (2*CIN, N*LH)  [even-phase channels ; odd-phase channels]
    w_ref,    # (COUT, W_TOTAL) packed [wd_flat | w1_flat | w2_flat]
    v_ref,    # (COUT, 6)       packed [b1 g1 be1 b2 g2 be2] columns
    o_ref,    # (COUT, N*LH)    output
):
    f32 = jnp.float32

    # ---- static slices of the packed operands (sub-vreg views) -------------
    wd = w_ref[:, 0:WD_COLS]                         # (COUT, 2*CIN)
    w1 = w_ref[:, WD_COLS:WD_COLS + WC_COLS]         # (COUT, K*COUT)
    w2 = w_ref[:, WD_COLS + WC_COLS:W_TOTAL]         # (COUT, K*COUT)
    b1 = v_ref[:, 0:1]
    g1 = v_ref[:, 1:2]
    be1 = v_ref[:, 2:3]
    b2 = v_ref[:, 3:4]
    g2 = v_ref[:, 4:5]
    be2 = v_ref[:, 5:6]

    # ---- hoisted constants (iota / compare / select only; no int div) ------
    # lane position within its batch segment
    lane = lax.broadcasted_iota(jnp.int32, (1, NL), 1)
    seg_off = jnp.zeros_like(lane)
    for b in range(1, N):
        seg_off = seg_off + jnp.where(lane >= b * LH, LH, 0)
    pos = lane - seg_off                                          # (1, NL)

    # per-tap boundary masks (shared by both convs)
    tap_masks = []
    for t in range(K):
        off = t - PAD
        tap_masks.append((pos + off >= 0) & (pos + off < LH))

    # batch-indicator matrix P (NL, NL): 1 where two lanes share a batch
    r_i = lax.broadcasted_iota(jnp.int32, (NL, NL), 0)
    c_j = lax.broadcasted_iota(jnp.int32, (NL, NL), 1)
    seg_r = jnp.zeros_like(r_i)
    seg_c = jnp.zeros_like(c_j)
    for b in range(1, N):
        seg_r = seg_r + jnp.where(r_i >= b * LH, 1, 0)
        seg_c = seg_c + jnp.where(c_j >= b * LH, 1, 0)
    p_mat = jnp.where(seg_r == seg_c, 1.0, 0.0).astype(f32)       # (NL, NL)

    # group-indicator matrix GA (COUT, COUT): 1 where channels share a group
    gr_i = lax.broadcasted_iota(jnp.int32, (COUT, COUT), 0)
    gc_j = lax.broadcasted_iota(jnp.int32, (COUT, COUT), 1)
    grp_r = jnp.zeros_like(gr_i)
    grp_c = jnp.zeros_like(gc_j)
    for g in range(1, G):
        grp_r = grp_r + jnp.where(gr_i >= g * CPG, 1, 0)
        grp_c = grp_c + jnp.where(gc_j >= g * CPG, 1, 0)
    ga_mat = jnp.where(grp_r == grp_c, 1.0, 0.0).astype(f32)      # (COUT, COUT)

    inv_count = 1.0 / (CPG * LH)

    # ---- downsample: Conv1d(CIN->COUT, k=2, stride=2, bias=False) ----------
    # one MXU call for both taps and the whole batch; also the residual.
    ds = jnp.dot(wd, x_ref[...], preferred_element_type=f32)       # (COUT, NL)

    # ---- Conv1d(COUT->COUT, k=5, pad=2) as ONE matmul over the full batch --
    # TODO(synk): on v7x, per-tap (COUT,COUT) matmuls with MRB accumulation
    # would skip the im2col build entirely; fused matmul kept for v5e/v6e MRF.
    def conv5(h, w_flat, bias):
        padded = jnp.concatenate(
            [jnp.zeros((COUT, PAD), f32), h, jnp.zeros((COUT, PAD), f32)],
            axis=1)                                                # (COUT, NL+2*PAD)
        taps = []
        for t in range(K):
            sh = padded[:, t:t + NL]                               # static lane slice
            if t != PAD:                                           # offset 0: no mask
                sh = jnp.where(tap_masks[t], sh, 0.0)
            taps.append(sh)
        im2col = jnp.concatenate(taps, axis=0)                     # (K*COUT, NL)
        return jnp.dot(w_flat, im2col, preferred_element_type=f32) + bias

    # ---- GroupNorm(4, COUT): per-(batch, group) stats via indicator matmuls
    def group_norm(h, gamma, beta):
        mu = jnp.dot(ga_mat,
                     jnp.dot(h, p_mat, preferred_element_type=f32),
                     preferred_element_type=f32) * inv_count       # (COUT, NL)
        d = h - mu
        var = jnp.dot(ga_mat,
                      jnp.dot(d * d, p_mat, preferred_element_type=f32),
                      preferred_element_type=f32) * inv_count
        return d * lax.rsqrt(var + EPS) * gamma + beta

    # ---- branch: conv1 -> (drop p=0) -> norm1 -> act -> conv2 -> norm2 -----
    h = conv5(ds, w1, b1)
    h = group_norm(h, g1, be1)
    h = _leaky(h)
    h = conv5(h, w2, b2)
    h = group_norm(h, g2, be2)

    # ---- residual add + final activation -----------------------------------
    o_ref[...] = _leaky(h + ds)


# ---------------------------------------------------------------------------
# one-time packing helpers (producer-side; NOT on the per-call critical path)
# ---------------------------------------------------------------------------
def pack_params(params):
    wd, w1, b1, g1, be1, w2, b2, g2, be2 = params
    # wd: (COUT, CIN, 2)  -> (COUT, 2*CIN), column = tap*CIN + in_channel
    wd_flat = jnp.transpose(wd, (0, 2, 1)).reshape(COUT, WD_COLS)
    # w1/w2: (COUT, COUT, K) -> (COUT, K*COUT), column = tap*COUT + in_channel
    w1_flat = jnp.transpose(w1, (0, 2, 1)).reshape(COUT, WC_COLS)
    w2_flat = jnp.transpose(w2, (0, 2, 1)).reshape(COUT, WC_COLS)
    w_slab = jnp.concatenate([wd_flat, w1_flat, w2_flat], axis=1)   # (COUT, 88)
    v_slab = jnp.stack([b1, g1, be1, b2, g2, be2], axis=1)          # (COUT, 6)
    return w_slab.astype(jnp.float32), v_slab.astype(jnp.float32)


def pack_input(x):
    """(N, CIN, L) -> (2*CIN, N*LH) even/odd-phase, batch on the lane axis."""
    x_even = x[:, :, 0::2]                                          # (N, CIN, LH)
    x_odd = x[:, :, 1::2]                                           # (N, CIN, LH)
    x_stack = jnp.concatenate([x_even, x_odd], axis=1)              # (N, 2CIN, LH)
    return jnp.transpose(x_stack, (1, 0, 2)).reshape(2 * CIN, NL).astype(jnp.float32)


def unpack_output(y):
    """(COUT, N*LH) -> (N, COUT, LH)."""
    return jnp.transpose(y.reshape(COUT, N, LH), (1, 0, 2))


_COST = pl.CostEstimate(
    flops=51_200,
    transcendentals=2 * COUT * NL,
    bytes_accessed=4 * (2 * CIN * NL + COUT * W_TOTAL + COUT * 6 + COUT * NL),
)


@jax.jit
def basic_block_down_packed(x_packed, w_slab, v_slab):
    vmem = pltpu.MemorySpace.VMEM
    return pl.pallas_call(
        basic_block_down_kernel,
        out_shape=jax.ShapeDtypeStruct((COUT, NL), jnp.float32),
        in_specs=[pl.BlockSpec(memory_space=vmem),
                  pl.BlockSpec(memory_space=vmem),
                  pl.BlockSpec(memory_space=vmem)],
        out_specs=pl.BlockSpec(memory_space=vmem),
        cost_estimate=_COST,
    )(x_packed, w_slab, v_slab)


# ---------------------------------------------------------------------------
# pure-JAX reference (mirrors the PyTorch forward, eval mode / dropout p=0)
# ---------------------------------------------------------------------------
def _conv1d_ref(x, w, b, stride=1, padding=0):
    out = lax.conv_general_dilated(
        x, w, window_strides=(stride,), padding=[(padding, padding)],
        dimension_numbers=("NCH", "OIH", "NCH"))
    if b is not None:
        out = out + b[None, :, None]
    return out


def _group_norm_ref(x, gamma, beta, groups=G, eps=EPS):
    n, c, l = x.shape
    xr = x.reshape(n, groups, c // groups, l)
    mu = xr.mean(axis=(2, 3), keepdims=True)
    var = ((xr - mu) ** 2).mean(axis=(2, 3), keepdims=True)
    xn = ((xr - mu) / jnp.sqrt(var + eps)).reshape(n, c, l)
    return xn * gamma[None, :, None] + beta[None, :, None]


def basic_block_down_ref(x, params):
    wd, w1, b1, g1, be1, w2, b2, g2, be2 = params
    out = _conv1d_ref(x, wd, None, stride=2, padding=0)      # downsample
    shortcut = out
    out = _conv1d_ref(out, w1, b1, stride=1, padding=PAD)    # conv1 (+drop p=0)
    out = _group_norm_ref(out, g1, be1)                      # norm1
    out = _leaky(out)                                        # act
    out = _conv1d_ref(out, w2, b2, stride=1, padding=PAD)    # conv2 (+drop p=0)
    out = _group_norm_ref(out, g2, be2)                      # norm2
    out = out + shortcut
    return _leaky(out)


# ---------------------------------------------------------------------------
if __name__ == "__main__":
    key = jax.random.PRNGKey(0)
    ks = jax.random.split(key, 10)

    x = jax.random.normal(ks[0], (N, CIN, L), jnp.float32)

    # deterministic synthetic parameters (module __init__ shapes)
    wd = 0.2 * jax.random.normal(ks[1], (COUT, CIN, 2), jnp.float32)   # downsample, no bias
    w1 = 0.1 * jax.random.normal(ks[2], (COUT, COUT, K), jnp.float32)  # conv1
    b1 = 0.1 * jax.random.normal(ks[3], (COUT,), jnp.float32)
    w2 = 0.1 * jax.random.normal(ks[4], (COUT, COUT, K), jnp.float32)  # conv2
    b2 = 0.1 * jax.random.normal(ks[5], (COUT,), jnp.float32)
    g1 = 1.0 + 0.1 * jax.random.normal(ks[6], (COUT,), jnp.float32)    # GroupNorm affine
    be1 = 0.1 * jax.random.normal(ks[7], (COUT,), jnp.float32)
    g2 = 1.0 + 0.1 * jax.random.normal(ks[8], (COUT,), jnp.float32)
    be2 = 0.1 * jax.random.normal(ks[9], (COUT,), jnp.float32)

    params = (wd, w1, b1, g1, be1, w2, b2, g2, be2)

    # one-time packing (outside the per-call path)
    w_slab, v_slab = jax.block_until_ready(pack_params(params))
    x_packed = jax.block_until_ready(pack_input(x))

    out_packed = jax.block_until_ready(
        basic_block_down_packed(x_packed, w_slab, v_slab))
    out = unpack_output(out_packed)

    ref = basic_block_down_ref(x, params)
    assert out.shape == (N, COUT, LH), out.shape
    err = float(jnp.max(jnp.abs(out - ref)))
    assert jnp.allclose(out, ref, atol=1e-4, rtol=1e-4), err

    print("KERNEL_OK")
</pallas_src>

<mosaic_0001>
module attributes {stable_mosaic.version = 11 : i64} {
  func.func @basic_block_down_kernel(%arg0: memref<8x16xf32, #tpu.memory_space<vmem>>, %arg1: memref<8x88xf32, #tpu.memory_space<vmem>>, %arg2: memref<8x6xf32, #tpu.memory_space<vmem>>, %arg3: memref<8x16xf32, #tpu.memory_space<vmem>>) attributes {dimension_semantics = [], scalar_prefetch = 0 : i64, scratch_operands = 0 : i64, tpu.core_type = #tpu.core_type<tc>} {
    %c0 = arith.constant 0 : index
    %c0_0 = arith.constant 0 : index
    %0 = vector.load %arg1[%c0, %c0_0] : memref<8x88xf32, #tpu.memory_space<vmem>>, vector<8x8xf32>
    %c0_1 = arith.constant 0 : index
    %c8 = arith.constant 8 : index
    %1 = vector.load %arg1[%c0_1, %c8] : memref<8x88xf32, #tpu.memory_space<vmem>>, vector<8x40xf32>
    %c0_2 = arith.constant 0 : index
    %c48 = arith.constant 48 : index
    %2 = vector.load %arg1[%c0_2, %c48] : memref<8x88xf32, #tpu.memory_space<vmem>>, vector<8x40xf32>
    %c0_3 = arith.constant 0 : index
    %c0_4 = arith.constant 0 : index
    %3 = vector.load %arg2[%c0_3, %c0_4] : memref<8x6xf32, #tpu.memory_space<vmem>>, vector<8x1xf32>
    %c0_5 = arith.constant 0 : index
    %c1 = arith.constant 1 : index
    %4 = vector.load %arg2[%c0_5, %c1] : memref<8x6xf32, #tpu.memory_space<vmem>>, vector<8x1xf32>
    %c0_6 = arith.constant 0 : index
    %c2 = arith.constant 2 : index
    %5 = vector.load %arg2[%c0_6, %c2] : memref<8x6xf32, #tpu.memory_space<vmem>>, vector<8x1xf32>
    %c0_7 = arith.constant 0 : index
    %c3 = arith.constant 3 : index
    %6 = vector.load %arg2[%c0_7, %c3] : memref<8x6xf32, #tpu.memory_space<vmem>>, vector<8x1xf32>
    %c0_8 = arith.constant 0 : index
    %c4 = arith.constant 4 : index
    %7 = vector.load %arg2[%c0_8, %c4] : memref<8x6xf32, #tpu.memory_space<vmem>>, vector<8x1xf32>
    %c0_9 = arith.constant 0 : index
    %c5 = arith.constant 5 : index
    %8 = vector.load %arg2[%c0_9, %c5] : memref<8x6xf32, #tpu.memory_space<vmem>>, vector<8x1xf32>
    %9 = tpu.iota {dimensions = array<i32: 1>} : vector<1x16xi32>
    %c0_i32 = arith.constant 0 : i32
    %10 = vector.broadcast %c0_i32 : i32 to vector<1x16xi32>
    %c8_i32 = arith.constant 8 : i32
    %11 = vector.broadcast %c8_i32 : i32 to vector<1x16xi32>
    %12 = arith.cmpi sge, %9, %11 : vector<1x16xi32>
    %c8_i32_10 = arith.constant 8 : i32
    %c0_i32_11 = arith.constant 0 : i32
    %13 = vector.broadcast %c8_i32_10 : i32 to vector<1x16xi32>
    %14 = vector.broadcast %c0_i32_11 : i32 to vector<1x16xi32>
    %15 = arith.select %12, %13, %14 : vector<1x16xi1>, vector<1x16xi32>
    %16 = arith.addi %10, %15 : vector<1x16xi32>
    %17 = arith.subi %9, %16 : vector<1x16xi32>
    %c-2_i32 = arith.constant -2 : i32
    %18 = vector.broadcast %c-2_i32 : i32 to vector<1x16xi32>
    %19 = arith.addi %17, %18 : vector<1x16xi32>
    %c0_i32_12 = arith.constant 0 : i32
    %20 = vector.broadcast %c0_i32_12 : i32 to vector<1x16xi32>
    %21 = arith.cmpi sge, %19, %20 : vector<1x16xi32>
    %c-2_i32_13 = arith.constant -2 : i32
    %22 = vector.broadcast %c-2_i32_13 : i32 to vector<1x16xi32>
    %23 = arith.addi %17, %22 : vector<1x16xi32>
    %c8_i32_14 = arith.constant 8 : i32
    %24 = vector.broadcast %c8_i32_14 : i32 to vector<1x16xi32>
    %25 = arith.cmpi slt, %23, %24 : vector<1x16xi32>
    %26 = arith.andi %21, %25 : vector<1x16xi1>
    %c-1_i32 = arith.constant -1 : i32
    %27 = vector.broadcast %c-1_i32 : i32 to vector<1x16xi32>
    %28 = arith.addi %17, %27 : vector<1x16xi32>
    %c0_i32_15 = arith.constant 0 : i32
    %29 = vector.broadcast %c0_i32_15 : i32 to vector<1x16xi32>
    %30 = arith.cmpi sge, %28, %29 : vector<1x16xi32>
    %c-1_i32_16 = arith.constant -1 : i32
    %31 = vector.broadcast %c-1_i32_16 : i32 to vector<1x16xi32>
    %32 = arith.addi %17, %31 : vector<1x16xi32>
    %c8_i32_17 = arith.constant 8 : i32
    %33 = vector.broadcast %c8_i32_17 : i32 to vector<1x16xi32>
    %34 = arith.cmpi slt, %32, %33 : vector<1x16xi32>
    %35 = arith.andi %30, %34 : vector<1x16xi1>
    %c1_i32 = arith.constant 1 : i32
    %36 = vector.broadcast %c1_i32 : i32 to vector<1x16xi32>
    %37 = arith.addi %17, %36 : vector<1x16xi32>
    %c0_i32_18 = arith.constant 0 : i32
    %38 = vector.broadcast %c0_i32_18 : i32 to vector<1x16xi32>
    %39 = arith.cmpi sge, %37, %38 : vector<1x16xi32>
    %c1_i32_19 = arith.constant 1 : i32
    %40 = vector.broadcast %c1_i32_19 : i32 to vector<1x16xi32>
    %41 = arith.addi %17, %40 : vector<1x16xi32>
    %c8_i32_20 = arith.constant 8 : i32
    %42 = vector.broadcast %c8_i32_20 : i32 to vector<1x16xi32>
    %43 = arith.cmpi slt, %41, %42 : vector<1x16xi32>
    %44 = arith.andi %39, %43 : vector<1x16xi1>
    %c2_i32 = arith.constant 2 : i32
    %45 = vector.broadcast %c2_i32 : i32 to vector<1x16xi32>
    %46 = arith.addi %17, %45 : vector<1x16xi32>
    %c0_i32_21 = arith.constant 0 : i32
    %47 = vector.broadcast %c0_i32_21 : i32 to vector<1x16xi32>
    %48 = arith.cmpi sge, %46, %47 : vector<1x16xi32>
    %c2_i32_22 = arith.constant 2 : i32
    %49 = vector.broadcast %c2_i32_22 : i32 to vector<1x16xi32>
    %50 = arith.addi %17, %49 : vector<1x16xi32>
    %c8_i32_23 = arith.constant 8 : i32
    %51 = vector.broadcast %c8_i32_23 : i32 to vector<1x16xi32>
    %52 = arith.cmpi slt, %50, %51 : vector<1x16xi32>
    %53 = arith.andi %48, %52 : vector<1x16xi1>
    %54 = tpu.iota {dimensions = array<i32: 0>} : vector<16x16xi32>
    %55 = tpu.iota {dimensions = array<i32: 1>} : vector<16x16xi32>
    %c0_i32_24 = arith.constant 0 : i32
    %56 = vector.broadcast %c0_i32_24 : i32 to vector<16x16xi32>
    %c0_i32_25 = arith.constant 0 : i32
    %57 = vector.broadcast %c0_i32_25 : i32 to vector<16x16xi32>
    %c8_i32_26 = arith.constant 8 : i32
    %58 = vector.broadcast %c8_i32_26 : i32 to vector<16x16xi32>
    %59 = arith.cmpi sge, %54, %58 : vector<16x16xi32>
    %c1_i32_27 = arith.constant 1 : i32
    %c0_i32_28 = arith.constant 0 : i32
    %60 = vector.broadcast %c1_i32_27 : i32 to vector<16x16xi32>
    %61 = vector.broadcast %c0_i32_28 : i32 to vector<16x16xi32>
    %62 = arith.select %59, %60, %61 : vector<16x16xi1>, vector<16x16xi32>
    %63 = arith.addi %56, %62 : vector<16x16xi32>
    %c8_i32_29 = arith.constant 8 : i32
    %64 = vector.broadcast %c8_i32_29 : i32 to vector<16x16xi32>
    %65 = arith.cmpi sge, %55, %64 : vector<16x16xi32>
    %c1_i32_30 = arith.constant 1 : i32
    %c0_i32_31 = arith.constant 0 : i32
    %66 = vector.broadcast %c1_i32_30 : i32 to vector<16x16xi32>
    %67 = vector.broadcast %c0_i32_31 : i32 to vector<16x16xi32>
    %68 = arith.select %65, %66, %67 : vector<16x16xi1>, vector<16x16xi32>
    %69 = arith.addi %57, %68 : vector<16x16xi32>
    %70 = arith.cmpi eq, %63, %69 : vector<16x16xi32>
    %cst = arith.constant 1.000000e+00 : f32
    %cst_32 = arith.constant 0.000000e+00 : f32
    %71 = vector.broadcast %cst : f32 to vector<16x16xf32>
    %72 = vector.broadcast %cst_32 : f32 to vector<16x16xf32>
    %73 = arith.select %70, %71, %72 : vector<16x16xi1>, vector<16x16xf32>
    %74 = tpu.iota {dimensions = array<i32: 0>} : vector<8x8xi32>
    %75 = tpu.iota {dimensions = array<i32: 1>} : vector<8x8xi32>
    %c0_i32_33 = arith.constant 0 : i32
    %76 = vector.broadcast %c0_i32_33 : i32 to vector<8x8xi32>
    %c0_i32_34 = arith.constant 0 : i32
    %77 = vector.broadcast %c0_i32_34 : i32 to vector<8x8xi32>
    %c2_i32_35 = arith.constant 2 : i32
    %78 = vector.broadcast %c2_i32_35 : i32 to vector<8x8xi32>
    %79 = arith.cmpi sge, %74, %78 : vector<8x8xi32>
    %c1_i32_36 = arith.constant 1 : i32
    %c0_i32_37 = arith.constant 0 : i32
    %80 = vector.broadcast %c1_i32_36 : i32 to vector<8x8xi32>
    %81 = vector.broadcast %c0_i32_37 : i32 to vector<8x8xi32>
    %82 = arith.select %79, %80, %81 : vector<8x8xi1>, vector<8x8xi32>
    %83 = arith.addi %76, %82 : vector<8x8xi32>
    %c2_i32_38 = arith.constant 2 : i32
    %84 = vector.broadcast %c2_i32_38 : i32 to vector<8x8xi32>
    %85 = arith.cmpi sge, %75, %84 : vector<8x8xi32>
    %c1_i32_39 = arith.constant 1 : i32
    %c0_i32_40 = arith.constant 0 : i32
    %86 = vector.broadcast %c1_i32_39 : i32 to vector<8x8xi32>
    %87 = vector.broadcast %c0_i32_40 : i32 to vector<8x8xi32>
    %88 = arith.select %85, %86, %87 : vector<8x8xi1>, vector<8x8xi32>
    %89 = arith.addi %77, %88 : vector<8x8xi32>
    %c4_i32 = arith.constant 4 : i32
    %90 = vector.broadcast %c4_i32 : i32 to vector<8x8xi32>
    %91 = arith.cmpi sge, %74, %90 : vector<8x8xi32>
    %c1_i32_41 = arith.constant 1 : i32
    %c0_i32_42 = arith.constant 0 : i32
    %92 = vector.broadcast %c1_i32_41 : i32 to vector<8x8xi32>
    %93 = vector.broadcast %c0_i32_42 : i32 to vector<8x8xi32>
    %94 = arith.select %91, %92, %93 : vector<8x8xi1>, vector<8x8xi32>
    %95 = arith.addi %83, %94 : vector<8x8xi32>
    %c4_i32_43 = arith.constant 4 : i32
    %96 = vector.broadcast %c4_i32_43 : i32 to vector<8x8xi32>
    %97 = arith.cmpi sge, %75, %96 : vector<8x8xi32>
    %c1_i32_44 = arith.constant 1 : i32
    %c0_i32_45 = arith.constant 0 : i32
    %98 = vector.broadcast %c1_i32_44 : i32 to vector<8x8xi32>
    %99 = vector.broadcast %c0_i32_45 : i32 to vector<8x8xi32>
    %100 = arith.select %97, %98, %99 : vector<8x8xi1>, vector<8x8xi32>
    %101 = arith.addi %89, %100 : vector<8x8xi32>
    %c6_i32 = arith.constant 6 : i32
    %102 = vector.broadcast %c6_i32 : i32 to vector<8x8xi32>
    %103 = arith.cmpi sge, %74, %102 : vector<8x8xi32>
    %c1_i32_46 = arith.constant 1 : i32
    %c0_i32_47 = arith.constant 0 : i32
    %104 = vector.broadcast %c1_i32_46 : i32 to vector<8x8xi32>
    %105 = vector.broadcast %c0_i32_47 : i32 to vector<8x8xi32>
    %106 = arith.select %103, %104, %105 : vector<8x8xi1>, vector<8x8xi32>
    %107 = arith.addi %95, %106 : vector<8x8xi32>
    %c6_i32_48 = arith.constant 6 : i32
    %108 = vector.broadcast %c6_i32_48 : i32 to vector<8x8xi32>
    %109 = arith.cmpi sge, %75, %108 : vector<8x8xi32>
    %c1_i32_49 = arith.constant 1 : i32
    %c0_i32_50 = arith.constant 0 : i32
    %110 = vector.broadcast %c1_i32_49 : i32 to vector<8x8xi32>
    %111 = vector.broadcast %c0_i32_50 : i32 to vector<8x8xi32>
    %112 = arith.select %109, %110, %111 : vector<8x8xi1>, vector<8x8xi32>
    %113 = arith.addi %101, %112 : vector<8x8xi32>
    %114 = arith.cmpi eq, %107, %113 : vector<8x8xi32>
    %cst_51 = arith.constant 1.000000e+00 : f32
    %cst_52 = arith.constant 0.000000e+00 : f32
    %115 = vector.broadcast %cst_51 : f32 to vector<8x8xf32>
    %116 = vector.broadcast %cst_52 : f32 to vector<8x8xf32>
    %117 = arith.select %114, %115, %116 : vector<8x8xi1>, vector<8x8xf32>
    %c0_53 = arith.constant 0 : index
    %c0_54 = arith.constant 0 : index
    %118 = vector.load %arg0[%c0_53, %c0_54] : memref<8x16xf32, #tpu.memory_space<vmem>>, vector<8x16xf32>
    %cst_55 = arith.constant dense<0.000000e+00> : vector<8x16xf32>
    %119 = tpu.matmul %0, %118, %cst_55 {dimension_numbers = #tpu.dot_dimension_numbers<[1], [0], [0], [1], [0, 0, 1, 1], [], []>} : vector<8x8xf32>, vector<8x16xf32>, vector<8x16xf32> -> vector<8x16xf32>
    %cst_56 = arith.constant 0.000000e+00 : f32
    %120 = vector.broadcast %cst_56 : f32 to vector<8x2xf32>
    %cst_57 = arith.constant 0.000000e+00 : f32
    %121 = vector.broadcast %cst_57 : f32 to vector<8x2xf32>
    %122 = tpu.concatenate %120, %119, %121 in 1 : vector<8x2xf32>, vector<8x16xf32>, vector<8x2xf32> -> vector<8x20xf32>
    %123 = vector.extract_strided_slice %122 {offsets = [0, 0], sizes = [8, 16], strides = [1, 1]} : vector<8x20xf32> to vector<8x16xf32>
    %cst_58 = arith.constant 0.000000e+00 : f32
    %124 = vector.shape_cast %26 : vector<1x16xi1> to vector<1x16xi1>
    %125 = vector.broadcast %124 : vector<1x16xi1> to vector<8x16xi1>
    %126 = vector.broadcast %cst_58 : f32 to vector<8x16xf32>
    %127 = arith.select %125, %123, %126 : vector<8x16xi1>, vector<8x16xf32>
    %128 = vector.extract_strided_slice %122 {offsets = [0, 1], sizes = [8, 16], strides = [1, 1]} : vector<8x20xf32> to vector<8x16xf32>
    %cst_59 = arith.constant 0.000000e+00 : f32
    %129 = vector.shape_cast %35 : vector<1x16xi1> to vector<1x16xi1>
    %130 = vector.broadcast %129 : vector<1x16xi1> to vector<8x16xi1>
    %131 = vector.broadcast %cst_59 : f32 to vector<8x16xf32>
    %132 = arith.select %130, %128, %131 : vector<8x16xi1>, vector<8x16xf32>
    %133 = vector.extract_strided_slice %122 {offsets = [0, 2], sizes = [8, 16], strides = [1, 1]} : vector<8x20xf32> to vector<8x16xf32>
    %134 = vector.extract_strided_slice %122 {offsets = [0, 3], sizes = [8, 16], strides = [1, 1]} : vector<8x20xf32> to vector<8x16xf32>
    %cst_60 = arith.constant 0.000000e+00 : f32
    %135 = vector.shape_cast %44 : vector<1x16xi1> to vector<1x16xi1>
    %136 = vector.broadcast %135 : vector<1x16xi1> to vector<8x16xi1>
    %137 = vector.broadcast %cst_60 : f32 to vector<8x16xf32>
    %138 = arith.select %136, %134, %137 : vector<8x16xi1>, vector<8x16xf32>
    %139 = vector.extract_strided_slice %122 {offsets = [0, 4], sizes = [8, 16], strides = [1, 1]} : vector<8x20xf32> to vector<8x16xf32>
    %cst_61 = arith.constant 0.000000e+00 : f32
    %140 = vector.shape_cast %53 : vector<1x16xi1> to vector<1x16xi1>
    %141 = vector.broadcast %140 : vector<1x16xi1> to vector<8x16xi1>
    %142 = vector.broadcast %cst_61 : f32 to vector<8x16xf32>
    %143 = arith.select %141, %139, %142 : vector<8x16xi1>, vector<8x16xf32>
    %144 = tpu.concatenate %127, %132, %133, %138, %143 in 0 : vector<8x16xf32>, vector<8x16xf32>, vector<8x16xf32>, vector<8x16xf32>, vector<8x16xf32> -> vector<40x16xf32>
    %cst_62 = arith.constant dense<0.000000e+00> : vector<8x16xf32>
    %145 = tpu.matmul %1, %144, %cst_62 {dimension_numbers = #tpu.dot_dimension_numbers<[1], [0], [0], [1], [0, 0, 1, 1], [], []>} : vector<8x40xf32>, vector<40x16xf32>, vector<8x16xf32> -> vector<8x16xf32>
    %146 = vector.broadcast %3 : vector<8x1xf32> to vector<8x16xf32>
    %147 = arith.addf %145, %146 : vector<8x16xf32>
    %cst_63 = arith.constant dense<0.000000e+00> : vector<8x16xf32>
    %148 = tpu.matmul %147, %73, %cst_63 {dimension_numbers = #tpu.dot_dimension_numbers<[1], [0], [0], [1], [0, 0, 1, 1], [], []>} : vector<8x16xf32>, vector<16x16xf32>, vector<8x16xf32> -> vector<8x16xf32>
    %cst_64 = arith.constant dense<0.000000e+00> : vector<8x16xf32>
    %149 = tpu.matmul %117, %148, %cst_64 {dimension_numbers = #tpu.dot_dimension_numbers<[1], [0], [0], [1], [0, 0, 1, 1], [], []>} : vector<8x8xf32>, vector<8x16xf32>, vector<8x16xf32> -> vector<8x16xf32>
    %cst_65 = arith.constant 6.250000e-02 : f32
    %150 = vector.broadcast %cst_65 : f32 to vector<8x16xf32>
    %151 = arith.mulf %149, %150 : vector<8x16xf32>
    %152 = arith.subf %147, %151 : vector<8x16xf32>
    %153 = arith.mulf %152, %152 : vector<8x16xf32>
    %cst_66 = arith.constant dense<0.000000e+00> : vector<8x16xf32>
    %154 = tpu.matmul %153, %73, %cst_66 {dimension_numbers = #tpu.dot_dimension_numbers<[1], [0], [0], [1], [0, 0, 1, 1], [], []>} : vector<8x16xf32>, vector<16x16xf32>, vector<8x16xf32> -> vector<8x16xf32>
    %cst_67 = arith.constant dense<0.000000e+00> : vector<8x16xf32>
    %155 = tpu.matmul %117, %154, %cst_67 {dimension_numbers = #tpu.dot_dimension_numbers<[1], [0], [0], [1], [0, 0, 1, 1], [], []>} : vector<8x8xf32>, vector<8x16xf32>, vector<8x16xf32> -> vector<8x16xf32>
    %cst_68 = arith.constant 6.250000e-02 : f32
    %156 = vector.broadcast %cst_68 : f32 to vector<8x16xf32>
    %157 = arith.mulf %155, %156 : vector<8x16xf32>
    %cst_69 = arith.constant 9.99999974E-6 : f32
    %158 = vector.broadcast %cst_69 : f32 to vector<8x16xf32>
    %159 = arith.addf %157, %158 : vector<8x16xf32>
    %160 = math.rsqrt %159 : vector<8x16xf32>
    %161 = arith.mulf %152, %160 : vector<8x16xf32>
    %162 = vector.broadcast %4 : vector<8x1xf32> to vector<8x16xf32>
    %163 = arith.mulf %161, %162 : vector<8x16xf32>
    %164 = vector.broadcast %5 : vector<8x1xf32> to vector<8x16xf32>
    %165 = arith.addf %163, %164 : vector<8x16xf32>
    %cst_70 = arith.constant 0.000000e+00 : f32
    %166 = vector.broadcast %cst_70 : f32 to vector<8x16xf32>
    %167 = arith.cmpf ogt, %165, %166 : vector<8x16xf32>
    %cst_71 = arith.constant 0.00999999977 : f32
    %168 = vector.broadcast %cst_71 : f32 to vector<8x16xf32>
    %169 = arith.mulf %168, %165 : vector<8x16xf32>
    %170 = arith.select %167, %165, %169 : vector<8x16xi1>, vector<8x16xf32>
    %cst_72 = arith.constant 0.000000e+00 : f32
    %171 = vector.broadcast %cst_72 : f32 to vector<8x2xf32>
    %cst_73 = arith.constant 0.000000e+00 : f32
    %172 = vector.broadcast %cst_73 : f32 to vector<8x2xf32>
    %173 = tpu.concatenate %171, %170, %172 in 1 : vector<8x2xf32>, vector<8x16xf32>, vector<8x2xf32> -> vector<8x20xf32>
    %174 = vector.extract_strided_slice %173 {offsets = [0, 0], sizes = [8, 16], strides = [1, 1]} : vector<8x20xf32> to vector<8x16xf32>
    %cst_74 = arith.constant 0.000000e+00 : f32
    %175 = vector.shape_cast %26 : vector<1x16xi1> to vector<1x16xi1>
    %176 = vector.broadcast %175 : vector<1x16xi1> to vector<8x16xi1>
    %177 = vector.broadcast %cst_74 : f32 to vector<8x16xf32>
    %178 = arith.select %176, %174, %177 : vector<8x16xi1>, vector<8x16xf32>
    %179 = vector.extract_strided_slice %173 {offsets = [0, 1], sizes = [8, 16], strides = [1, 1]} : vector<8x20xf32> to vector<8x16xf32>
    %cst_75 = arith.constant 0.000000e+00 : f32
    %180 = vector.shape_cast %35 : vector<1x16xi1> to vector<1x16xi1>
    %181 = vector.broadcast %180 : vector<1x16xi1> to vector<8x16xi1>
    %182 = vector.broadcast %cst_75 : f32 to vector<8x16xf32>
    %183 = arith.select %181, %179, %182 : vector<8x16xi1>, vector<8x16xf32>
    %184 = vector.extract_strided_slice %173 {offsets = [0, 2], sizes = [8, 16], strides = [1, 1]} : vector<8x20xf32> to vector<8x16xf32>
    %185 = vector.extract_strided_slice %173 {offsets = [0, 3], sizes = [8, 16], strides = [1, 1]} : vector<8x20xf32> to vector<8x16xf32>
    %cst_76 = arith.constant 0.000000e+00 : f32
    %186 = vector.shape_cast %44 : vector<1x16xi1> to vector<1x16xi1>
    %187 = vector.broadcast %186 : vector<1x16xi1> to vector<8x16xi1>
    %188 = vector.broadcast %cst_76 : f32 to vector<8x16xf32>
    %189 = arith.select %187, %185, %188 : vector<8x16xi1>, vector<8x16xf32>
    %190 = vector.extract_strided_slice %173 {offsets = [0, 4], sizes = [8, 16], strides = [1, 1]} : vector<8x20xf32> to vector<8x16xf32>
    %cst_77 = arith.constant 0.000000e+00 : f32
    %191 = vector.shape_cast %53 : vector<1x16xi1> to vector<1x16xi1>
    %192 = vector.broadcast %191 : vector<1x16xi1> to vector<8x16xi1>
    %193 = vector.broadcast %cst_77 : f32 to vector<8x16xf32>
    %194 = arith.select %192, %190, %193 : vector<8x16xi1>, vector<8x16xf32>
    %195 = tpu.concatenate %178, %183, %184, %189, %194 in 0 : vector<8x16xf32>, vector<8x16xf32>, vector<8x16xf32>, vector<8x16xf32>, vector<8x16xf32> -> vector<40x16xf32>
    %cst_78 = arith.constant dense<0.000000e+00> : vector<8x16xf32>
    %196 = tpu.matmul %2, %195, %cst_78 {dimension_numbers = #tpu.dot_dimension_numbers<[1], [0], [0], [1], [0, 0, 1, 1], [], []>} : vector<8x40xf32>, vector<40x16xf32>, vector<8x16xf32> -> vector<8x16xf32>
    %197 = vector.broadcast %6 : vector<8x1xf32> to vector<8x16xf32>
    %198 = arith.addf %196, %197 : vector<8x16xf32>
    %cst_79 = arith.constant dense<0.000000e+00> : vector<8x16xf32>
    %199 = tpu.matmul %198, %73, %cst_79 {dimension_numbers = #tpu.dot_dimension_numbers<[1], [0], [0], [1], [0, 0, 1, 1], [], []>} : vector<8x16xf32>, vector<16x16xf32>, vector<8x16xf32> -> vector<8x16xf32>
    %cst_80 = arith.constant dense<0.000000e+00> : vector<8x16xf32>
    %200 = tpu.matmul %117, %199, %cst_80 {dimension_numbers = #tpu.dot_dimension_numbers<[1], [0], [0], [1], [0, 0, 1, 1], [], []>} : vector<8x8xf32>, vector<8x16xf32>, vector<8x16xf32> -> vector<8x16xf32>
    %cst_81 = arith.constant 6.250000e-02 : f32
    %201 = vector.broadcast %cst_81 : f32 to vector<8x16xf32>
    %202 = arith.mulf %200, %201 : vector<8x16xf32>
    %203 = arith.subf %198, %202 : vector<8x16xf32>
    %204 = arith.mulf %203, %203 : vector<8x16xf32>
    %cst_82 = arith.constant dense<0.000000e+00> : vector<8x16xf32>
    %205 = tpu.matmul %204, %73, %cst_82 {dimension_numbers = #tpu.dot_dimension_numbers<[1], [0], [0], [1], [0, 0, 1, 1], [], []>} : vector<8x16xf32>, vector<16x16xf32>, vector<8x16xf32> -> vector<8x16xf32>
    %cst_83 = arith.constant dense<0.000000e+00> : vector<8x16xf32>
    %206 = tpu.matmul %117, %205, %cst_83 {dimension_numbers = #tpu.dot_dimension_numbers<[1], [0], [0], [1], [0, 0, 1, 1], [], []>} : vector<8x8xf32>, vector<8x16xf32>, vector<8x16xf32> -> vector<8x16xf32>
    %cst_84 = arith.constant 6.250000e-02 : f32
    %207 = vector.broadcast %cst_84 : f32 to vector<8x16xf32>
    %208 = arith.mulf %206, %207 : vector<8x16xf32>
    %cst_85 = arith.constant 9.99999974E-6 : f32
    %209 = vector.broadcast %cst_85 : f32 to vector<8x16xf32>
    %210 = arith.addf %208, %209 : vector<8x16xf32>
    %211 = math.rsqrt %210 : vector<8x16xf32>
    %212 = arith.mulf %203, %211 : vector<8x16xf32>
    %213 = vector.broadcast %7 : vector<8x1xf32> to vector<8x16xf32>
    %214 = arith.mulf %212, %213 : vector<8x16xf32>
    %215 = vector.broadcast %8 : vector<8x1xf32> to vector<8x16xf32>
    %216 = arith.addf %214, %215 : vector<8x16xf32>
    %217 = arith.addf %216, %119 : vector<8x16xf32>
    %cst_86 = arith.constant 0.000000e+00 : f32
    %218 = vector.broadcast %cst_86 : f32 to vector<8x16xf32>
    %219 = arith.cmpf ogt, %217, %218 : vector<8x16xf32>
    %cst_87 = arith.constant 0.00999999977 : f32
    %220 = vector.broadcast %cst_87 : f32 to vector<8x16xf32>
    %221 = arith.mulf %220, %217 : vector<8x16xf32>
    %222 = arith.select %219, %217, %221 : vector<8x16xi1>, vector<8x16xf32>
    %c0_88 = arith.constant 0 : index
    %c0_89 = arith.constant 0 : index
    %223 = vector.load %arg3[%c0_88, %c0_89] : memref<8x16xf32, #tpu.memory_space<vmem>>, vector<8x16xf32>
    tpu.vector_store %arg3[%c0_88, %c0_89], %222 {strides = array<i32>} : memref<8x16xf32, #tpu.memory_space<vmem>>, vector<8x16xf32>,
    return
  }
}

</mosaic_0001>

<bundles_post_ra>
// kernel: basic_block_down_packed.1
= control target key start
LH: loop header
LB: loop body
LE: loop exit
PB: predicated region body
PF: predicated region fallthrough
CT: control target
= control target key end

     0   :  { %8 = vsyncpa [#allocation3], 0  ;;  %s1576_s0 = inlined_call_operand.hbm [shape: f32[8,16], index: 0, kind: input, shape index: {}]   ;;  %s1577_s1 = inlined_call_operand.hbm [shape: f32[8,88], index: 1, kind: input, shape index: {}]   ;;  %s1578_s2 = inlined_call_operand.hbm [shape: f32[8,6], index: 2, kind: input, shape index: {}]   ;;  %s1579_s3 = inlined_call_operand.hbm [shape: f32[8,16], index: 3, kind: output, shape index: {}]  }
   0x1   :  { %9 = vsyncpa [#allocation6], 0 }
   0x2   :  { %10 = vsyncpa [#allocation4], 0  ;;  %s1324_s12 = smov [#allocation5]   ;;  %s1325_s14 = smov [#allocation2]  }
   0x3   :  { %s27_s13 = sshll.u32 %s1324_s12, 4  ;;  %s17_s15 = sshll.u32 %s1325_s14, 4  ;;  %s28_s13 = int_to_ptr.vmem [resolvable:$true] %s27_s13  ;;  %s18_s15 = int_to_ptr.vmem [resolvable:$true] %s17_s15 }
   0x4   :  { %s1230_s18 = scalar_lea.hbm %s1577_s1, 128 }
   0x5   :  { %p1231_p0 = scmp.ne.s32.totalorder %s1577_s1, %s1230_s18  ;;  %p1234_p1 = scmp.lt.u32.totalorder %s1230_s18, %s1577_s1 }
   0x7   :  { %p1236_p2 = pnand %p1234_p1, %p1231_p0 }
   0x9   :  { %1239 = shalt.err (!%p1236_p2)
}
   0xa   :  { %s1240_s23 = scalar_lea.vmem %s28_s13, 128  ;;  %p1245_p4 = scmp.lt.s32.totalorder %s28_s13, %s28_s13 }
   0xb   :  { %p1241_p3 = scmp.ne.s32.totalorder %s28_s13, %s1240_s23  ;;  %p1246_p5 = scmp.lt.s32.totalorder %s1240_s23, %s1240_s23 }
   0xd   :  { %p1247_p6 = por %p1246_p5, %p1245_p4 }
   0xf   :  { %p1248_p7 = pnand %p1247_p6, %p1241_p3 }
  0x11   :  { %1251 = shalt.err (!%p1248_p7)
}
  0x12   :  { %30 = dma.hbm_to_vmem [thread:$0]  %s1577_s1, 128, %s28_s13, [#allocation6]  }
  0x13   :  { %s1252_s28 = scalar_lea.hbm %s1576_s0, 128 }
  0x14   :  { %p1253_p8 = scmp.ne.s32.totalorder %s1576_s0, %s1252_s28  ;;  %p1256_p9 = scmp.lt.u32.totalorder %s1252_s28, %s1576_s0 }
  0x16   :  { %p1258_p10 = pnand %p1256_p9, %p1253_p8 }
  0x18   :  { %1261 = shalt.err (!%p1258_p10)
}
  0x19   :  { %s1262_s6 = scalar_lea.vmem %s18_s15, 128  ;;  %p1267_p12 = scmp.lt.s32.totalorder %s18_s15, %s18_s15 }
  0x1a   :  { %p1263_p11 = scmp.ne.s32.totalorder %s18_s15, %s1262_s6  ;;  %p1268_p13 = scmp.lt.s32.totalorder %s1262_s6, %s1262_s6 }
  0x1c   :  { %p1269_p0 = por %p1268_p13, %p1267_p12 }
  0x1e   :  { %p1270_p1 = pnand %p1269_p0, %p1263_p11 }
  0x20   :  { %1273 = shalt.err (!%p1270_p1)
}
  0x21   :  { %20 = dma.hbm_to_vmem [thread:$0]  %s1576_s0, 128, %s18_s15, [#allocation3]  }
  0x22   :  { %s1326_s8 = smov [#allocation7]   ;;  %s1274_s12 = scalar_lea.hbm %s1578_s2, 128 }
  0x23   :  { %s37_s9 = sshll.u32 %s1326_s8, 4  ;;  %p1275_p2 = scmp.ne.s32.totalorder %s1578_s2, %s1274_s12  ;;  %s38_s9 = int_to_ptr.vmem [resolvable:$true] %s37_s9 }
  0x24   :  { %p1278_p3 = scmp.lt.u32.totalorder %s1274_s12, %s1578_s2 }
  0x26   :  { %p1280_p4 = pnand %p1278_p3, %p1275_p2 }
  0x28   :  { %1283 = shalt.err (!%p1280_p4)
}
  0x29   :  { %s1284_s18 = scalar_lea.vmem %s38_s9, 128  ;;  %p1289_p6 = scmp.lt.s32.totalorder %s38_s9, %s38_s9 }
  0x2a   :  { %p1285_p5 = scmp.ne.s32.totalorder %s38_s9, %s1284_s18  ;;  %p1290_p7 = scmp.lt.s32.totalorder %s1284_s18, %s1284_s18 }
  0x2c   :  { %p1291_p8 = por %p1290_p7, %p1289_p6 }
  0x2e   :  { %p1292_p9 = pnand %p1291_p8, %p1285_p5 }
  0x30   :  { %1295 = shalt.err (!%p1292_p9)
}
  0x31   :  { %40 = dma.hbm_to_vmem [thread:$0]  %s1578_s2, 128, %s38_s9, [#allocation6]  }
  0x32   :  { %1318 = dma.done.wait [#allocation3], 128  }
  0x33   :  { %1319 = vsyncadd [#allocation3], 4294967168 }
  0x34   :  { %1320 = dma.done.wait [#allocation6], 256  }
  0x35   :  { %1321 = vsyncadd [#allocation6], 4294967040  ;;  %v1327_v0 = vmov 0.0   ;;  %vm1328_vm0 = vmmov 0   ;;  %vm104_vm1 = vcmask 64512   ;;  %v103_v1 = vld [vmem:[#allocation2] sm:$0xff]  ;;  %v52_v11 = vlaneseq }
  0x36   :  { %1090 = vmatprep.subr.mxu0 %v1327_v0  ;;  %1092 = vmatprep.mubr.msk.f32.mxu0 %vm1328_vm0, %v1327_v0  ;;  %v1407_v2 = vld [vmem:[#allocation5] sm:$0xff]  ;;  %s1329_s2 = smov 2   ;;  %v1330_v5 = vmov 0   ;;  %v1331_v6 = vmov 0.0|0.0   ;;  %vm182_vm2 = vcmask 15360   ;;  %vm1582_vm3 = vcmask 146432  }
  0x37   :  { %1105 = vmatprep.mubr.msk.f32.mxu1 %vm1328_vm0, %v1327_v0  ;;  %1091 = vmatpush3.msra.mxu0 %v103_v1  ;;  %s1332_s19 = smov 125   ;;  %s1333_s20 = smov 127   ;;  %v1426_v10 = vld [vmem:[#allocation7] sm:$0xff]  ;;  %v1430_v12 = vand.u32 127, %v52_v11  ;;  %vm1337_vm15 = vmmov 1   ;;  %v74_v36 = vshrl.u32 %v52_v11, 7 }
  0x38   :  { %1093 = vmatmul.mubr.msk.f32.vlgmr.msra.gmra.mrb[0].mxu0 %vm104_vm1, %v1407_v2  ;;  %1219 = vset.pattern.permute.xlu0 %v1330_v5  ;;  %s1334_s21 = smov 126   ;;  %s1335_s22 = smov 124   ;;  %v1338_v31 = vmov 1.0|1.0   ;;  %v1339_v55 = vmov 1   ;;  %v1340_v56 = vmov 2  }
  0x39   :  { %1112 = vmatprep.mubr.msk.f32.mxu0 %vm1328_vm0, %v1327_v0  ;;  %1169 = vmatprep.subr.bf16.mxu1 %v1331_v6  ;;  %s1336_s23 = smov 120   ;;  %vm54_vm4 = vcmp.ge.s32.totalorder %v1430_v12, 8  ;;  %s1342_s24 = smov 80  }
  0x3a   :  { %1177 = vmatprep.subr.bf16.mxu0 %v1331_v6  ;;  %v55_v13 = vsel %vm54_vm4, 8, %v1330_v5  ;;  %1220 = vset.pattern.permute.xlu1 %v1339_v55  ;;  %s1345_s25 = smov [#allocation8]  }
  0x3b   :  { %v56_v14 = vsub.s32 %v1430_v12, %v55_v13  ;;  %s1016_s26 = sshll.u32 %s1345_s25, 4  ;;  %s1017_s26 = int_to_ptr.vmem [resolvable:$true] %s1016_s26 }
  0x3c   :  { %s1296_s27 = scalar_lea.vmem %s1017_s26, 128  ;;  %p1301_p11 = scmp.lt.s32.totalorder %s1017_s26, %s1017_s26 }
  0x3d   :  { %v57_v15 = vadd.s32 4294967294, %v56_v14  ;;  %v61_v16 = vadd.s32 4294967295, %v56_v14  ;;  %v65_v17 = vadd.s32 1, %v56_v14  ;;  %v69_v23 = vadd.s32 2, %v56_v14  ;;  %p1297_p10 = scmp.ne.s32.totalorder %s1017_s26, %s1296_s27  ;;  %p1302_p12 = scmp.lt.s32.totalorder %s1296_s27, %s1296_s27 }
  0x3f   :  { %vm58_vm5 = vcmp.ge.s32.totalorder %v57_v15, 0  ;;  %vm59_vm6 = vcmp.lt.s32.totalorder %v57_v15, 8  ;;  %vm62_vm7 = vcmp.ge.s32.totalorder %v61_v16, 0  ;;  %vm63_vm8 = vcmp.lt.s32.totalorder %v61_v16, 8  ;;  %p1303_p13 = por %p1302_p12, %p1301_p11 }
  0x40   :  { %vm1437_vm9 = vmand %vm58_vm5, %vm59_vm6  ;;  %vm66_vm11 = vcmp.ge.s32.totalorder %v65_v17, 0  ;;  %vm67_vm12 = vcmp.lt.s32.totalorder %v65_v17, 8  ;;  %vm70_vm6 = vcmp.ge.s32.totalorder %v69_v23, 0  ;;  %v1341_v15 = vmov 3  }
  0x41   :  { %vm1441_vm10 = vmand %vm62_vm7, %vm63_vm8  ;;  %vm71_vm7 = vcmp.lt.s32.totalorder %v69_v23, 8  ;;  %p1304_p0 = pnand %p1303_p13, %p1297_p10 }
  0x42   :  { %vm1581_vm13 = vmpackc.low %vm1441_vm10, %vm1437_vm9 }
  0x43   :  { %vm68_vm14 = vmand %vm66_vm11, %vm67_vm12  ;;  %vm1580_vm11 = vcmask 326656  }
  0x44   :  { %vm1455_vm5 = vmpackc.low %vm68_vm14, %vm1337_vm15  ;;  %vm291_vm15 = vcmask 130048  }
  0x45   :  { %vm1462_vm8 = vmand %vm70_vm6, %vm71_vm7  ;;  %vm87_vm6 = vcmp.ge.s32.totalorder %v1430_v12, 2  ;;  %vm89_vm7 = vcmp.ge.s32.totalorder %v74_v36, 4 }
  0x46   :  { %vm1055_vm12 = vmneg %vm54_vm4  ;;  %v88_v38 = vsel %vm87_vm6, 1, %v1330_v5  ;;  %v90_v39 = vsel %vm89_vm7, 1, %v1330_v5 }
  0x47   :  { %vm1476_vm14 = vmpackc.low %vm54_vm4, %vm1055_vm12  ;;  %vm85_vm4 = vcmp.ge.s32.totalorder %v74_v36, 2  ;;  %vm92_vm12 = vcmp.ge.s32.totalorder %v1430_v12, 4 }
  0x48   :  { %1179 = vmatpush3.bf16.msk.msra.mxu0 %vm1476_vm14, %v1338_v31  ;;  %v86_v37 = vsel %vm85_vm4, 1, %v1330_v5  ;;  %v93_v40 = vsel %vm92_vm12, 1, %v1330_v5 }
  0x49   :  { %1115 = vmatprep.subr.mxu0 %v1327_v0  ;;  %v91_v41 = vadd.s32 %v90_v39, %v86_v37  ;;  %v94_v42 = vadd.s32 %v93_v40, %v88_v38 }
 0x10b   :  { %v1413_v3 = vpop.f32.mrb[0].mxu0 }
 0x10c   :  { %179 = vrot.lane.b32.xlu0 %v1413_v3, %s1329_s2  ;;  %v1094_v4 = vpop.f32.mrb[1].mxu0 }
 0x17e   :  { %v180_v7 = vpop.permute.xlu0 %179 }
 0x17f   :  { %v183_v8 = vsel %vm182_vm2, 0.0, %v180_v7 }
 0x180   :  { %v185_v9 = vsel %vm1582_vm3, %v183_v8, 0.0 }
 0x181   :  { %198 = vrot.lane.b32.xlu1 %v185_v9, %s1332_s19  ;;  %192 = vrot.lane.b32.xlu0 %v185_v9, %s1333_s20 }
 0x185   :  { %208 = vrot.lane.b32.xlu1 %v185_v9, %s1334_s21  ;;  %204 = vrot.lane.b32.xlu0 %v185_v9, %s1335_s22 }
 0x189   :  { %216 = vrot.lane.b32.xlu1 %v1407_v2, %s1336_s23  ;;  %213 = vperm.xlu0 %1219, %v1426_v10  }
 0x18d   :  { %589 = vperm.xlu1 %1220, %v1426_v10   ;;  %1222 = vset.pattern.permute.xlu0 %v1341_v15 }
 0x191   :  { %1221 = vset.pattern.permute.xlu1 %v1340_v56 }
 0x192   :  { %594 = vperm.xlu1 %1221, %v1426_v10  }
 0x1f3   :  { %v199_v20 = vpop.permute.xlu1 %198  ;;  %v193_v21 = vpop.permute.xlu0 %192 }
 0x1f4   :  { %v1170_v22 = vpack.c.bf16 %v193_v21, %v185_v9 }
 0x1f6   :  { %1172 = vmatpush3.bf16.msk.msra.mxu1 %vm1581_vm13, %v1170_v22  ;;  %vm98_vm13 = vcmp.ge.s32.totalorder %v1430_v12, 6 }
 0x1f7   :  { %v209_v24 = vpop.permute.xlu1 %208  ;;  %1173 = vmatprep.subr.bf16.mxu1 %v1331_v6  ;;  %v205_v29 = vpop.permute.xlu0 %204  ;;  %v99_v44 = vsel %vm98_vm13, 1, %v1330_v5  ;;  %vm1593_vm13 = vcmask 146432  }
 0x1f8   :  { %v1174_v26 = vpack.c.bf16 %v199_v20, %v209_v24  ;;  %v100_v46 = vadd.s32 %v99_v44, %v94_v42 }
 0x1fa   :  { %1176 = vmatpush3.bf16.msk.msra.mxu1 %vm1455_vm5, %v1174_v26 }
 0x1fb   :  { %1103 = vmatprep.subr.mxu1 %v1327_v0  ;;  %v217_v28 = vpop.permute.xlu1 %216 }
 0x1fe   :  { %1104 = vmatpush3.msk.msra.mxu1 %vm1462_vm8, %v205_v29 }
 0x1ff   :  { %1106 = vmatmul.mubr.msk.f32.vlgmr.msra.gmra.mrb[0].mxu1 %vm1580_vm11, %v217_v28  ;;  %1127 = vmatprep.subr.mxu1 %v1327_v0  ;;  %vm95_vm11 = vcmp.ge.s32.totalorder %v74_v36, 6  ;;  %v1344_v36 = vmov 5  }
 0x200   :  { %1129 = vmatprep.mubr.msk.f32.mxu1 %vm1328_vm0, %v1327_v0  ;;  %v96_v43 = vsel %vm95_vm11, 1, %v1330_v5  ;;  %vm1595_vm11 = vcmask 326656  }
 0x201   :  { %v97_v45 = vadd.s32 %v96_v43, %v91_v41 }
 0x203   :  { %vm101_vm3 = vcmp.eq.s32.totalorder %v97_v45, %v100_v46 }
 0x204   :  { %v1497_v47 = vsel %vm101_vm3, 1.0, %v1327_v0 }
 0x208   :  { %v214_v32 = vpop.permute.xlu0 %213 }
 0x20c   :  { %v590_v63 = vpop.permute.xlu1 %589 }
 0x211   :  { %v595_v5 = vpop.permute.xlu1 %594 }
 0x2d2   :  { %v287_v33 = vpop.f32.mrb[0].mxu1 }
 0x2d3   :  { %v288_v34 = vadd.f32 %v287_v33, %v214_v32  ;;  %v1107_v35 = vpop.f32.mrb[1].mxu1 }
 0x2d4   :  { %v1343_v35 = vmov 4  }
 0x2d5   :  { %1113 = vmatmul.mubr.msk.f32.vlgmr.msra.gmra.mrb[2].mxu0 %vm291_vm15, %v288_v34  ;;  %1223 = vset.pattern.permute.xlu1 %v1343_v35 }
 0x2d6   :  { %1117 = vmatprep.mubr.msk.f32.mxu0 %vm1328_vm0, %v1327_v0 }
 0x3a8   :  { %v361_v48 = vpop.f32.mrb[2].mxu0 }
 0x3a9   :  { %v1114_v49 = vpop.f32.mrb[3].mxu0  ;;  %1116 = vmatpush3.msra.mxu0 %v361_v48 }
 0x3aa   :  { %1118 = vmatmul.mubr.msk.f32.vlgmr.msra.gmra.mrb[4].mxu0 %vm104_vm1, %v1497_v47  ;;  %1180 = vmatprep.subr.bf16.mxu0 %v1331_v6 }
 0x3ab   :  { %1182 = vmatpush3.bf16.msk.msra.mxu0 %vm1476_vm14, %v1338_v31  ;;  %1124 = vmatprep.mubr.msk.f32.mxu0 %vm1328_vm0, %v1327_v0 }
 0x3ac   :  { %1183 = vmatprep.subr.bf16.mxu0 %v1331_v6 }
 0x47d   :  { %v434_v50 = vpop.f32.mrb[4].mxu0 }
 0x47e   :  { %v438_v51 = vmul.f32 0.0625, %v434_v50  ;;  %v1119_v52 = vpop.f32.mrb[5].mxu0 }
 0x480   :  { %v439_v53 = vsub.f32 %v288_v34, %v438_v51 }
 0x482   :  { %v440_v54 = vmul.f32 %v439_v53, %v439_v53 }
 0x484   :  { %1125 = vmatmul.mubr.msk.f32.vlgmr.msra.gmra.mrb[6].mxu0 %vm291_vm15, %v440_v54 }
 0x485   :  { %1142 = vmatprep.mubr.msk.f32.mxu0 %vm1328_vm0, %v1327_v0 }
 0x557   :  { %v510_v57 = vpop.f32.mrb[6].mxu0 }
 0x558   :  { %v1126_v58 = vpop.f32.mrb[7].mxu0  ;;  %1128 = vmatpush3.msra.mxu1 %v510_v57 }
 0x559   :  { %1130 = vmatmul.mubr.msk.f32.vlgmr.msra.gmra.mrb[2].mxu1 %vm104_vm1, %v1497_v47  ;;  %1191 = vmatprep.subr.bf16.mxu1 %v1331_v6 }
 0x55a   :  { %1193 = vmatpush3.bf16.msk.msra.mxu1 %vm1476_vm14, %v1338_v31  ;;  %1149 = vmatprep.mubr.msk.f32.mxu1 %vm1328_vm0, %v1327_v0 }
 0x55b   :  { %1152 = vmatprep.subr.mxu1 %v1327_v0 }
 0x62c   :  { %v580_v59 = vpop.f32.mrb[2].mxu1 }
 0x62d   :  { %v584_v60 = vmul.f32 0.0625, %v580_v59  ;;  %v1131_v61 = vpop.f32.mrb[3].mxu1 }
 0x62f   :  { %v585_v62 = vadd.f32 1e-05, %v584_v60 }
 0x631   :  { %1226 = vrsqrt.f32 %v585_v62 }
 0x63b   :  { %v1227_v1 = vpop.eup %1226 }
 0x63c   :  { %v587_v4 = vmul.f32 %v1227_v1, %v439_v53 }
 0x63e   :  { %v592_v7 = vmul.f32 %v590_v63, %v587_v4 }
 0x640   :  { %v597_v8 = vadd.f32 %v595_v5, %v592_v7 }
 0x642   :  { %v599_v9 = vmul.f32 0.01, %v597_v8  ;;  %vm598_vm3 = vcmp.gt.f32.partialorder %v597_v8, 0.0 }
 0x644   :  { %v600_v11 = vsel %vm598_vm3, %v597_v8, %v599_v9 }
 0x645   :  { %602 = vrot.lane.b32.xlu0 %v600_v11, %s1329_s2 }
 0x6b7   :  { %v603_v12 = vpop.permute.xlu0 %602 }
 0x6b8   :  { %v605_v13 = vsel %vm182_vm2, 0.0, %v603_v12  ;;  %vm1594_vm2 = vmpackc.low %vm1441_vm10, %vm1437_vm9 }
 0x6b9   :  { %v606_v14 = vsel %vm1593_vm13, %v605_v13, 0.0 }
 0x6ba   :  { %613 = vrot.lane.b32.xlu0 %v606_v14, %s1332_s19  ;;  %609 = vrot.lane.b32.xlu1 %v606_v14, %s1333_s20 }
 0x6be   :  { %617 = vrot.lane.b32.xlu0 %v606_v14, %s1335_s22  ;;  %621 = vrot.lane.b32.xlu1 %v606_v14, %s1334_s21 }
 0x6c2   :  { %628 = vrot.lane.b32.xlu1 %v1407_v2, %s1342_s24  ;;  %625 = vperm.xlu0 %1222, %v1426_v10  }
 0x6c6   :  { %1225 = vset.pattern.permute.xlu0 %v1344_v36  ;;  %996 = vperm.xlu1 %1223, %v1426_v10  }
 0x6ca   :  { %1224 = vset.pattern.permute.xlu1 %v1344_v36 }
 0x6cb   :  { %1001 = vperm.xlu1 %1224, %v1426_v10  }
 0x72c   :  { %v610_v16 = vpop.permute.xlu1 %609  ;;  %v614_v20 = vpop.permute.xlu0 %613 }
 0x72d   :  { %v1184_v17 = vpack.c.bf16 %v610_v16, %v606_v14 }
 0x72f   :  { %1186 = vmatpush3.bf16.msk.msra.mxu0 %vm1594_vm2, %v1184_v17 }
 0x730   :  { %v622_v21 = vpop.permute.xlu1 %621  ;;  %1187 = vmatprep.subr.bf16.mxu0 %v1331_v6  ;;  %v618_v23 = vpop.permute.xlu0 %617 }
 0x731   :  { %v1188_v22 = vpack.c.bf16 %v614_v20, %v622_v21 }
 0x733   :  { %1190 = vmatpush3.bf16.msk.msra.mxu0 %vm1455_vm5, %v1188_v22 }
 0x734   :  { %1140 = vmatprep.subr.mxu0 %v1327_v0  ;;  %v629_v2 = vpop.permute.xlu1 %628 }
 0x737   :  { %1141 = vmatpush3.msk.msra.mxu0 %vm1462_vm8, %v618_v23 }
 0x738   :  { %1143 = vmatmul.mubr.msk.f32.vlgmr.msra.gmra.mrb[8].mxu0 %vm1595_vm11, %v629_v2  ;;  %1164 = vmatprep.subr.mxu0 %v1327_v0 }
 0x739   :  { %1166 = vmatprep.mubr.msk.f32.mxu0 %vm1328_vm0, %v1327_v0 }
 0x741   :  { %v626_v18 = vpop.permute.xlu0 %625 }
 0x745   :  { %v997_v39 = vpop.permute.xlu1 %996 }
 0x74a   :  { %v1002_v42 = vpop.permute.xlu1 %1001 }
 0x80b   :  { %v698_v19 = vpop.f32.mrb[8].mxu0 }
 0x80c   :  { %v699_v24 = vadd.f32 %v698_v19, %v626_v18  ;;  %v1144_v26 = vpop.f32.mrb[9].mxu0 }
 0x80e   :  { %1150 = vmatmul.mubr.msk.f32.vlgmr.msra.gmra.mrb[4].mxu1 %vm291_vm15, %v699_v24 }
 0x80f   :  { %1154 = vmatprep.mubr.msk.f32.mxu1 %vm1328_vm0, %v1327_v0 }
 0x8e1   :  { %v771_v25 = vpop.f32.mrb[4].mxu1 }
 0x8e2   :  { %v1151_v28 = vpop.f32.mrb[5].mxu1  ;;  %1153 = vmatpush3.msra.mxu1 %v771_v25 }
 0x8e3   :  { %1155 = vmatmul.mubr.msk.f32.vlgmr.msra.gmra.mrb[6].mxu1 %vm104_vm1, %v1497_v47  ;;  %1194 = vmatprep.subr.bf16.mxu1 %v1331_v6 }
 0x8e4   :  { %1196 = vmatpush3.bf16.msk.msra.mxu1 %vm1476_vm14, %v1338_v31  ;;  %1161 = vmatprep.mubr.msk.f32.mxu1 %vm1328_vm0, %v1327_v0 }
 0x9b6   :  { %v841_v27 = vpop.f32.mrb[6].mxu1 }
 0x9b7   :  { %v845_v29 = vmul.f32 0.0625, %v841_v27  ;;  %v1156_v32 = vpop.f32.mrb[7].mxu1 }
 0x9b9   :  { %v846_v33 = vsub.f32 %v699_v24, %v845_v29 }
 0x9bb   :  { %v847_v34 = vmul.f32 %v846_v33, %v846_v33 }
 0x9bd   :  { %1162 = vmatmul.mubr.msk.f32.vlgmr.msra.gmra.mrb[8].mxu1 %vm291_vm15, %v847_v34 }
 0xa90   :  { %v917_v6 = vpop.f32.mrb[8].mxu1 }
 0xa91   :  { %v1163_v30 = vpop.f32.mrb[9].mxu1  ;;  %1165 = vmatpush3.msra.mxu0 %v917_v6 }
 0xa92   :  { %1167 = vmatmul.mubr.msk.f32.vlgmr.msra.gmra.mrb[10].mxu0 %vm104_vm1, %v1497_v47 }
 0xb65   :  { %v987_v0 = vpop.f32.mrb[10].mxu0 }
 0xb66   :  { %v991_v31 = vmul.f32 0.0625, %v987_v0  ;;  %v1168_v37 = vpop.f32.mrb[11].mxu0 }
 0xb68   :  { %v992_v38 = vadd.f32 1e-05, %v991_v31 }
 0xb6a   :  { %1228 = vrsqrt.f32 %v992_v38 }
 0xb74   :  { %v1229_v40 = vpop.eup %1228 }
 0xb75   :  { %v994_v41 = vmul.f32 %v1229_v40, %v846_v33 }
 0xb77   :  { %v999_v43 = vmul.f32 %v997_v39, %v994_v41 }
 0xb79   :  { %v1004_v44 = vadd.f32 %v1002_v42, %v999_v43 }
 0xb7b   :  { %v1005_v45 = vadd.f32 %v1004_v44, %v1413_v3 }
 0xb7d   :  { %v1007_v10 = vmul.f32 0.01, %v1005_v45  ;;  %vm1006_vm0 = vcmp.gt.f32.partialorder %v1005_v45, 0.0 }
 0xb7f   :  { %v1008_v46 = vsel %vm1006_vm0, %v1005_v45, %v1007_v10 }
 0xb80   :  { %1009 = vst.msk [vmem:[#allocation8] sm:$0xff] %vm291_vm15, %v1008_v46 }
 0xb81   :  { %1307 = shalt.err (!%p1304_p0)
}
 0xb82   :  { %s1308_s30 = scalar_lea.hbm %s1579_s3, 128 }
 0xb83   :  { %p1309_p1 = scmp.ne.s32.totalorder %s1579_s3, %s1308_s30  ;;  %p1312_p2 = scmp.lt.u32.totalorder %s1308_s30, %s1579_s3 }
 0xb85   :  { %p1314_p3 = pnand %p1312_p2, %p1309_p1 }
 0xb87   :  { %1317 = shalt.err (!%p1314_p3)
}
 0xb88   :  { %1019 = dma.vmem_to_hbm [thread:$0]  %s1017_s26, 128, %s1579_s3, [#allocation4]  }
 0xb89   :  { %1322 = dma.done.wait [#allocation4], 128  }
 0xb8a   :  { %1323 = vsyncadd [#allocation4], 4294967168 }
 0xb8b   :  { %1023 = vsyncpa [#allocation3], 1 }
 0xb8c   :  { %1024 = vsyncpa [#allocation6], 1 }
 0xb8d   :  { %1025 = vsyncpa [#allocation4], 1 }

</bundles_post_ra>
